<compile_context>
chip_gen: v5e
topology: v5e:2x2
jax: 0.10.0
libtpu: 0.0.40
codegen_flags: <defaults>
</compile_context>

<pallas_src>
import functools
import math

import jax
import jax.numpy as jnp
from jax.experimental import pallas as pl
from jax.experimental.pallas import tpu as pltpu

GIN_HIDDEN = 100      # nn.Linear(feat_dim, 100) hard-coded in GRCU_GIN.forward
LANE = 128
MAX_TILE = 1024       # 1024 tiles hit ~85%+ of HBM roofline on v5e and are
                      # comfortably within the 48 MiB VMEM cap on v7x.


def _round_up(x, m):
    return (x + m - 1) // m * m


def _pick_tile(n_pad, max_tile=MAX_TILE):
    """Largest multiple of 128 that divides n_pad, capped at max_tile."""
    t = min(max_tile, n_pad)
    while n_pad % t:
        t -= LANE
    return t


# ----------------------------------------------------------------------------
# Pallas kernel: fused (Adj + I) @ X @ W + b for one (timestep, row-tile)
# ----------------------------------------------------------------------------
def gin_layer_kernel(adj_ref, x_ref, w_ref, b_ref, out_ref, h_acc_ref, *, tk):
    k = pl.program_id(2)

    @pl.when(k == 0)
    def _():
        h_acc_ref[...] = jnp.zeros_like(h_acc_ref)

    # AdjI arrives as int8 edge counts; cast to bf16 on the VPU (hidden under
    # the DMA) so the MXU dot runs bf16 x bf16 -> f32 on every generation.
    adj = adj_ref[...].astype(jnp.bfloat16)
    # X_t is fully VMEM-resident; slice out the k-th row block in-kernel.
    k0 = pl.multiple_of(k * tk, LANE)
    xk = x_ref[pl.ds(k0, tk), :]
    h_acc_ref[...] += jnp.dot(adj, xk, preferred_element_type=jnp.float32)

    @pl.when(k == pl.num_programs(2) - 1)
    def _():
        h = h_acc_ref[...].astype(jnp.bfloat16)
        out = jnp.dot(h, w_ref[...], preferred_element_type=jnp.float32)
        # bias add in f32; cast to the output dtype (bf16 for intermediate
        # layers, f32 for the final layer) on the way out.
        out_ref[...] = (out + b_ref[...]).astype(out_ref.dtype)


def gin_layer(adjI, x, w, b, out_dtype):
    """One GRCU_GIN layer over T timesteps.

    adjI: (T, N_pad, N_pad)      int8  -- Adj + I edge counts, zero padded
    x:    (T, N_pad, Fin_pad)    bf16  -- node features, zero padded
    w:    (T, Fin_pad, Fout_pad) bf16  -- per-timestep Linear weight (transposed)
    b:    (T, 1, Fout_pad)       f32   -- per-timestep Linear bias
    ->    (T, N_pad, Fout_pad)   out_dtype
    """
    T, n_pad, _ = adjI.shape
    fin_pad = x.shape[-1]
    fout_pad = w.shape[-1]
    tm = _pick_tile(n_pad)
    tk = _pick_tile(n_pad)
    grid = (T, n_pad // tm, n_pad // tk)

    out_itemsize = jnp.dtype(out_dtype).itemsize
    # Rough double-buffered VMEM estimate; raise the scoped limit explicitly
    # (v5e default is only 16 MiB) but cap at 48 MiB for v7x's 64 MiB VMEM.
    est_bytes = (
        2 * tm * tk * 1                 # AdjI tile, int8, double-buffered
        + 2 * n_pad * fin_pad * 2       # resident X_t, bf16, double-buffered
        + 2 * fin_pad * fout_pad * 2    # W_t
        + 2 * fout_pad * 4              # b_t
        + 2 * tm * fout_pad * out_itemsize   # output tile
        + tm * fin_pad * 4              # f32 accumulator scratch
    )
    vmem_limit = int(min(48 << 20, max(est_bytes + (4 << 20), 16 << 20)))

    return pl.pallas_call(
        functools.partial(gin_layer_kernel, tk=tk),
        out_shape=jax.ShapeDtypeStruct((T, n_pad, fout_pad), out_dtype),
        grid=grid,
        in_specs=[
            pl.BlockSpec((None, tm, tk), lambda t, i, k: (t, i, k)),
            # X_t fully resident in VMEM; only re-DMA'd when t changes.
            pl.BlockSpec((None, n_pad, fin_pad), lambda t, i, k: (t, 0, 0)),
            pl.BlockSpec((None, fin_pad, fout_pad), lambda t, i, k: (t, 0, 0)),
            pl.BlockSpec((None, 1, fout_pad), lambda t, i, k: (t, 0, 0)),
        ],
        out_specs=pl.BlockSpec((None, tm, fout_pad), lambda t, i, k: (t, i, 0)),
        scratch_shapes=[pltpu.VMEM((tm, fin_pad), jnp.float32)],
        compiler_params=pltpu.CompilerParams(
            dimension_semantics=("parallel", "parallel", "arbitrary"),
            vmem_limit_bytes=vmem_limit,
        ),
    )(adjI, x, w, b)


@jax.jit
def egcn_apply(adjI_stack, x0_stack, layer_params):
    """Run all layers; each layer is one pipelined pallas_call."""
    feats = x0_stack
    num_layers = len(layer_params)
    out = None
    for li, (w_stack, b_stack) in enumerate(layer_params):
        if li == num_layers - 1:
            # Only the last timestep of the last layer is consumed downstream:
            # run the final layer on t = T-1 only (T-fold FLOP/HBM cut, exact).
            out = gin_layer(adjI_stack[-1:], feats[-1:], w_stack[-1:],
                            b_stack[-1:], out_dtype=jnp.float32)
        else:
            # Intermediate activations come out of the kernel already in bf16
            # (no separate f32 writeback + XLA recast roundtrip).
            out = gin_layer(adjI_stack, feats, w_stack, b_stack,
                            out_dtype=jnp.bfloat16)
            feats = out
    return out


# ----------------------------------------------------------------------------
# Parameter / input preparation (outside the kernel timing path)
# ----------------------------------------------------------------------------
def make_linear_params(key, fin, fout):
    """Deterministic stand-in for torch.nn.Linear default init (fresh per call)."""
    bound = 1.0 / math.sqrt(fin)
    k_w, k_b = jax.random.split(key)
    w = jax.random.uniform(k_w, (fin, fout), jnp.float32, -bound, bound)
    b = jax.random.uniform(k_b, (fout,), jnp.float32, -bound, bound)
    return w, b


def build_layer_params(param_key, T, fin_list):
    """Stacked, zero-padded per-(layer, t) Linear params."""
    fout_pad = _round_up(GIN_HIDDEN, LANE)
    params = []
    for layer, fin in enumerate(fin_list):
        fin_pad = _round_up(fin, LANE)
        w_stack, b_stack = [], []
        for t in range(T):
            k = jax.random.fold_in(param_key, layer * 10007 + t)
            w, b = make_linear_params(k, fin, GIN_HIDDEN)
            w_pad = jnp.zeros((fin_pad, fout_pad), jnp.float32)
            w_pad = w_pad.at[:fin, :GIN_HIDDEN].set(w)
            b_pad = jnp.zeros((1, fout_pad), jnp.float32)
            b_pad = b_pad.at[0, :GIN_HIDDEN].set(b)
            w_stack.append(w_pad)
            b_stack.append(b_pad)
        params.append(
            (jnp.stack(w_stack).astype(jnp.bfloat16), jnp.stack(b_stack))
        )
    return params


def edges_to_dense_adj(u, v, n_nodes):
    """Dense adjacency Adj[dst, src] (multi-edges accumulate, as in GIN 'sum')."""
    adj = jnp.zeros((n_nodes, n_nodes), jnp.float32)
    return adj.at[v, u].add(1.0)


def egcn_forward(A_dense_list, nodes_list, nodes_mask_list, *, param_key,
                 num_layers=2, skipfeats=False):
    # nodes_mask_list is accepted for signature parity but unused (as in the
    # PyTorch forward path, where evolve_weights / TopK are never invoked).
    del nodes_mask_list
    node_feats = nodes_list[-1]
    T = len(A_dense_list)
    N, fin0 = nodes_list[0].shape

    n_pad = _round_up(N, LANE)        # pad to 128 only; tiles divide n_pad
    fin0_pad = _round_up(fin0, LANE)

    # AdjI = Adj + I (folds the GIN self-term into the adjacency matmul),
    # stored as int8 edge counts (cast to bf16 in-kernel).
    # NOTE: multi-edge counts must fit in int8; clamp defensively.
    eye = jnp.eye(N, dtype=jnp.float32)
    adjI_f32 = jnp.stack([
        jnp.zeros((n_pad, n_pad), jnp.float32).at[:N, :N].set(a + eye)
        for a in A_dense_list
    ])
    adjI = jnp.clip(jnp.round(adjI_f32), 0, 127).astype(jnp.int8)

    x0 = jnp.stack([
        jnp.zeros((n_pad, fin0_pad), jnp.float32).at[:N, :fin0].set(x)
        for x in nodes_list
    ]).astype(jnp.bfloat16)

    fin_list = [fin0] + [GIN_HIDDEN] * (num_layers - 1)
    layer_params = build_layer_params(param_key, T, fin_list)

    out_pad = egcn_apply(adjI, x0, layer_params)   # (1, N_pad, Fout_pad) f32
    out = out_pad[-1, :N, :GIN_HIDDEN]             # last timestep of last layer
    if skipfeats:
        out = jnp.concatenate([out, node_feats], axis=1)
    return out


# ----------------------------------------------------------------------------
# Pure-JAX reference (f32, unpadded) for correctness checking
# ----------------------------------------------------------------------------
def egcn_reference(A_dense_list, nodes_list, param_key, num_layers):
    feats = list(nodes_list)
    for layer in range(num_layers):
        new_feats = []
        for t, adj in enumerate(A_dense_list):
            x = feats[t]
            fin = x.shape[1]
            k = jax.random.fold_in(param_key, layer * 10007 + t)
            w, b = make_linear_params(k, fin, GIN_HIDDEN)
            h = x + adj @ x
            new_feats.append(h @ w + b)
        feats = new_feats
    return feats[-1]


# ----------------------------------------------------------------------------
# Demo
# ----------------------------------------------------------------------------
if __name__ == "__main__":
    key = jax.random.PRNGKey(0)

    N = 16              # number of nodes
    FEATS_PER_NODE = 8  # args.feats_per_node
    T = 3               # number of snapshots (len(A_list))
    E = 32              # edges per snapshot
    NUM_LAYERS = 2      # feats = [feats_per_node, layer_1_feats, layer_2_feats]

    k_feat, k_edge, k_param = jax.random.split(key, 3)

    # Node feature snapshots (dense stand-ins for the sparse inputs).
    nodes_list = [
        jax.random.normal(jax.random.fold_in(k_feat, t), (N, FEATS_PER_NODE),
                          jnp.float32)
        for t in range(T)
    ]

    # Sparse adjacency per snapshot -> dense [dst, src] matrix.
    A_dense_list = []
    for t in range(T):
        ke = jax.random.fold_in(k_edge, t)
        ku, kv = jax.random.split(ke)
        u = jax.random.randint(ku, (E,), 0, N)
        v = jax.random.randint(kv, (E,), 0, N)
        A_dense_list.append(edges_to_dense_adj(u, v, N))

    # Node masks (unused by the forward path, kept for signature parity).
    nodes_mask_list = [jnp.zeros((N, 1), jnp.float32) for _ in range(T)]

    out = egcn_forward(A_dense_list, nodes_list, nodes_mask_list,
                       param_key=k_param, num_layers=NUM_LAYERS,
                       skipfeats=False)
    out = jax.block_until_ready(out)

    ref = egcn_reference(A_dense_list, nodes_list, k_param, NUM_LAYERS)

    assert out.shape == (N, GIN_HIDDEN), out.shape
    assert bool(jnp.all(jnp.isfinite(out)))
    max_abs_err = float(jnp.max(jnp.abs(out - ref)))
    tol = 0.05 * (1.0 + float(jnp.max(jnp.abs(ref))))   # bf16 matmul operands
    assert max_abs_err <= tol, (max_abs_err, tol)
    print("KERNEL_OK")
</pallas_src>

<mosaic_0001>
module attributes {stable_mosaic.version = 11 : i64} {
  func.func @gin_layer_kernel(%arg0: i32, %arg1: i32, %arg2: i32, %arg3: memref<1x128x128xi8, #tpu.memory_space<vmem>>, %arg4: memref<1x128x128xbf16, #tpu.memory_space<vmem>>, %arg5: memref<1x128x128xbf16, #tpu.memory_space<vmem>>, %arg6: memref<1x1x128xf32, #tpu.memory_space<vmem>>, %arg7: memref<1x128x128xbf16, #tpu.memory_space<vmem>>, %arg8: memref<128x128xf32, #tpu.memory_space<vmem>>) attributes {dimension_semantics = [#tpu.dimension_semantics<parallel>, #tpu.dimension_semantics<parallel>, #tpu.dimension_semantics<arbitrary>], iteration_bounds = array<i64: 3, 1, 1>, scalar_prefetch = 0 : i64, scratch_operands = 1 : i64, tpu.core_type = #tpu.core_type<tc>, window_params = [{transform_indices = @transform_0, window_bounds = array<i64: 1, 128, 128>}, {transform_indices = @transform_1, window_bounds = array<i64: 1, 128, 128>}, {transform_indices = @transform_2, window_bounds = array<i64: 1, 128, 128>}, {transform_indices = @transform_3, window_bounds = array<i64: 1, 1, 128>}, {transform_indices = @transform_4, window_bounds = array<i64: 1, 128, 128>}]} {
    %c0_i32 = arith.constant 0 : i32
    %0 = arith.cmpi eq, %arg2, %c0_i32 : i32
    %1 = arith.extui %0 : i1 to i32
    %c0_i32_0 = arith.constant 0 : i32
    %2 = arith.cmpi ne, %1, %c0_i32_0 : i32
    scf.if %2 {
      %cst_11 = arith.constant 0.000000e+00 : f32
      %18 = vector.broadcast %cst_11 : f32 to vector<128x128xf32>
      %c0_12 = arith.constant 0 : index
      %c0_13 = arith.constant 0 : index
      %19 = vector.load %arg8[%c0_12, %c0_13] : memref<128x128xf32, #tpu.memory_space<vmem>>, vector<128x128xf32>
      tpu.vector_store %arg8[%c0_12, %c0_13], %18 {strides = array<i32>} : memref<128x128xf32, #tpu.memory_space<vmem>>, vector<128x128xf32>,
    } else {
    }
    %c0 = arith.constant 0 : index
    %c0_1 = arith.constant 0 : index
    %c0_2 = arith.constant 0 : index
    %3 = vector.load %arg3[%c0, %c0_1, %c0_2] : memref<1x128x128xi8, #tpu.memory_space<vmem>>, vector<1x128x128xi8>
    %4 = vector.shape_cast %3 : vector<1x128x128xi8> to vector<128x128xi8>
    %5 = arith.sitofp %4 : vector<128x128xi8> to vector<128x128xbf16>
    %c128_i32 = arith.constant 128 : i32
    %6 = arith.muli %arg2, %c128_i32 : i32
    %7 = tpu.assume_multiple %6, 128 : i32
    %c0_3 = arith.constant 0 : index
    %8 = arith.index_cast %7 : i32 to index
    %c0_4 = arith.constant 0 : index
    %9 = vector.load %arg4[%c0_3, %8, %c0_4] : memref<1x128x128xbf16, #tpu.memory_space<vmem>>, vector<1x128x128xbf16>
    %10 = vector.shape_cast %9 : vector<1x128x128xbf16> to vector<128x128xbf16>
    %c0_5 = arith.constant 0 : index
    %c0_6 = arith.constant 0 : index
    %11 = vector.load %arg8[%c0_5, %c0_6] : memref<128x128xf32, #tpu.memory_space<vmem>>, vector<128x128xf32>
    %cst = arith.constant dense<0.000000e+00> : vector<128x128xf32>
    %12 = tpu.matmul %5, %10, %cst {dimension_numbers = #tpu.dot_dimension_numbers<[1], [0], [0], [1], [0, 0, 1, 1], [], []>} : vector<128x128xbf16>, vector<128x128xbf16>, vector<128x128xf32> -> vector<128x128xf32>
    %13 = arith.addf %11, %12 : vector<128x128xf32>
    %c0_7 = arith.constant 0 : index
    %c0_8 = arith.constant 0 : index
    %14 = vector.load %arg8[%c0_7, %c0_8] : memref<128x128xf32, #tpu.memory_space<vmem>>, vector<128x128xf32>
    tpu.vector_store %arg8[%c0_7, %c0_8], %13 {strides = array<i32>} : memref<128x128xf32, #tpu.memory_space<vmem>>, vector<128x128xf32>,
    %c0_i32_9 = arith.constant 0 : i32
    %15 = arith.cmpi eq, %arg2, %c0_i32_9 : i32
    %16 = arith.extui %15 : i1 to i32
    %c0_i32_10 = arith.constant 0 : i32
    %17 = arith.cmpi ne, %16, %c0_i32_10 : i32
    scf.if %17 {
      %c0_11 = arith.constant 0 : index
      %c0_12 = arith.constant 0 : index
      %18 = vector.load %arg8[%c0_11, %c0_12] : memref<128x128xf32, #tpu.memory_space<vmem>>, vector<128x128xf32>
      %19 = arith.truncf %18 : vector<128x128xf32> to vector<128x128xbf16>
      %c0_13 = arith.constant 0 : index
      %c0_14 = arith.constant 0 : index
      %c0_15 = arith.constant 0 : index
      %20 = vector.load %arg5[%c0_13, %c0_14, %c0_15] : memref<1x128x128xbf16, #tpu.memory_space<vmem>>, vector<1x128x128xbf16>
      %21 = vector.shape_cast %20 : vector<1x128x128xbf16> to vector<128x128xbf16>
      %cst_16 = arith.constant dense<0.000000e+00> : vector<128x128xf32>
      %22 = tpu.matmul %19, %21, %cst_16 {dimension_numbers = #tpu.dot_dimension_numbers<[1], [0], [0], [1], [0, 0, 1, 1], [], []>} : vector<128x128xbf16>, vector<128x128xbf16>, vector<128x128xf32> -> vector<128x128xf32>
      %c0_17 = arith.constant 0 : index
      %c0_18 = arith.constant 0 : index
      %c0_19 = arith.constant 0 : index
      %23 = vector.load %arg6[%c0_17, %c0_18, %c0_19] : memref<1x1x128xf32, #tpu.memory_space<vmem>>, vector<1x1x128xf32>
      %24 = vector.shape_cast %23 : vector<1x1x128xf32> to vector<1x128xf32>
      %25 = vector.broadcast %24 : vector<1x128xf32> to vector<128x128xf32>
      %26 = arith.addf %22, %25 : vector<128x128xf32>
      %27 = arith.truncf %26 : vector<128x128xf32> to vector<128x128xbf16>
      %c0_20 = arith.constant 0 : index
      %c0_21 = arith.constant 0 : index
      %c0_22 = arith.constant 0 : index
      %28 = vector.load %arg7[%c0_20, %c0_21, %c0_22] : memref<1x128x128xbf16, #tpu.memory_space<vmem>>, vector<1x128x128xbf16>
      %29 = vector.shape_cast %28 : vector<1x128x128xbf16> to vector<128x128xbf16>
      %30 = vector.shape_cast %27 : vector<128x128xbf16> to vector<1x128x128xbf16>
      tpu.vector_store %arg7[%c0_20, %c0_21, %c0_22], %30 {strides = array<i32>} : memref<1x128x128xbf16, #tpu.memory_space<vmem>>, vector<1x128x128xbf16>,
    } else {
    }
    return
  }
  func.func @transform_0(%arg0: i32, %arg1: i32, %arg2: i32) -> (i32, i32, i32) {
    %c0_i32 = arith.constant 0 : i32
    return %arg0, %arg1, %arg2 : i32, i32, i32
  }
  func.func @transform_1(%arg0: i32, %arg1: i32, %arg2: i32) -> (i32, i32, i32) {
    %c0_i32 = arith.constant 0 : i32
    %c0_i32_0 = arith.constant 0 : i32
    %c0_i32_1 = arith.constant 0 : i32
    return %arg0, %c0_i32, %c0_i32_0 : i32, i32, i32
  }
  func.func @transform_2(%arg0: i32, %arg1: i32, %arg2: i32) -> (i32, i32, i32) {
    %c0_i32 = arith.constant 0 : i32
    %c0_i32_0 = arith.constant 0 : i32
    %c0_i32_1 = arith.constant 0 : i32
    return %arg0, %c0_i32, %c0_i32_0 : i32, i32, i32
  }
  func.func @transform_3(%arg0: i32, %arg1: i32, %arg2: i32) -> (i32, i32, i32) {
    %c0_i32 = arith.constant 0 : i32
    %c0_i32_0 = arith.constant 0 : i32
    %c0_i32_1 = arith.constant 0 : i32
    return %arg0, %c0_i32, %c0_i32_0 : i32, i32, i32
  }
  func.func @transform_4(%arg0: i32, %arg1: i32, %arg2: i32) -> (i32, i32, i32) {
    %c0_i32 = arith.constant 0 : i32
    %c0_i32_0 = arith.constant 0 : i32
    return %arg0, %arg1, %c0_i32 : i32, i32, i32
  }
}

module attributes {stable_mosaic.version = 11 : i64} {
  func.func @gin_layer_kernel(%arg0: i32, %arg1: i32, %arg2: i32, %arg3: memref<1x128x128xi8, #tpu.memory_space<vmem>>, %arg4: memref<1x128x128xbf16, #tpu.memory_space<vmem>>, %arg5: memref<1x128x128xbf16, #tpu.memory_space<vmem>>, %arg6: memref<1x1x128xf32, #tpu.memory_space<vmem>>, %arg7: memref<1x128x128xf32, #tpu.memory_space<vmem>>, %arg8: memref<128x128xf32, #tpu.memory_space<vmem>>) attributes {dimension_semantics = [#tpu.dimension_semantics<parallel>, #tpu.dimension_semantics<parallel>, #tpu.dimension_semantics<arbitrary>], iteration_bounds = array<i64: 1, 1, 1>, scalar_prefetch = 0 : i64, scratch_operands = 1 : i64, tpu.core_type = #tpu.core_type<tc>, window_params = [{transform_indices = @transform_0, window_bounds = array<i64: 1, 128, 128>}, {transform_indices = @transform_1, window_bounds = array<i64: 1, 128, 128>}, {transform_indices = @transform_2, window_bounds = array<i64: 1, 128, 128>}, {transform_indices = @transform_3, window_bounds = array<i64: 1, 1, 128>}, {transform_indices = @transform_4, window_bounds = array<i64: 1, 128, 128>}]} {
    %c0_i32 = arith.constant 0 : i32
    %0 = arith.cmpi eq, %arg2, %c0_i32 : i32
    %1 = arith.extui %0 : i1 to i32
    %c0_i32_0 = arith.constant 0 : i32
    %2 = arith.cmpi ne, %1, %c0_i32_0 : i32
    scf.if %2 {
      %cst_11 = arith.constant 0.000000e+00 : f32
      %18 = vector.broadcast %cst_11 : f32 to vector<128x128xf32>
      %c0_12 = arith.constant 0 : index
      %c0_13 = arith.constant 0 : index
      %19 = vector.load %arg8[%c0_12, %c0_13] : memref<128x128xf32, #tpu.memory_space<vmem>>, vector<128x128xf32>
      tpu.vector_store %arg8[%c0_12, %c0_13], %18 {strides = array<i32>} : memref<128x128xf32, #tpu.memory_space<vmem>>, vector<128x128xf32>,
    } else {
    }
    %c0 = arith.constant 0 : index
    %c0_1 = arith.constant 0 : index
    %c0_2 = arith.constant 0 : index
    %3 = vector.load %arg3[%c0, %c0_1, %c0_2] : memref<1x128x128xi8, #tpu.memory_space<vmem>>, vector<1x128x128xi8>
    %4 = vector.shape_cast %3 : vector<1x128x128xi8> to vector<128x128xi8>
    %5 = arith.sitofp %4 : vector<128x128xi8> to vector<128x128xbf16>
    %c128_i32 = arith.constant 128 : i32
    %6 = arith.muli %arg2, %c128_i32 : i32
    %7 = tpu.assume_multiple %6, 128 : i32
    %c0_3 = arith.constant 0 : index
    %8 = arith.index_cast %7 : i32 to index
    %c0_4 = arith.constant 0 : index
    %9 = vector.load %arg4[%c0_3, %8, %c0_4] : memref<1x128x128xbf16, #tpu.memory_space<vmem>>, vector<1x128x128xbf16>
    %10 = vector.shape_cast %9 : vector<1x128x128xbf16> to vector<128x128xbf16>
    %c0_5 = arith.constant 0 : index
    %c0_6 = arith.constant 0 : index
    %11 = vector.load %arg8[%c0_5, %c0_6] : memref<128x128xf32, #tpu.memory_space<vmem>>, vector<128x128xf32>
    %cst = arith.constant dense<0.000000e+00> : vector<128x128xf32>
    %12 = tpu.matmul %5, %10, %cst {dimension_numbers = #tpu.dot_dimension_numbers<[1], [0], [0], [1], [0, 0, 1, 1], [], []>} : vector<128x128xbf16>, vector<128x128xbf16>, vector<128x128xf32> -> vector<128x128xf32>
    %13 = arith.addf %11, %12 : vector<128x128xf32>
    %c0_7 = arith.constant 0 : index
    %c0_8 = arith.constant 0 : index
    %14 = vector.load %arg8[%c0_7, %c0_8] : memref<128x128xf32, #tpu.memory_space<vmem>>, vector<128x128xf32>
    tpu.vector_store %arg8[%c0_7, %c0_8], %13 {strides = array<i32>} : memref<128x128xf32, #tpu.memory_space<vmem>>, vector<128x128xf32>,
    %c0_i32_9 = arith.constant 0 : i32
    %15 = arith.cmpi eq, %arg2, %c0_i32_9 : i32
    %16 = arith.extui %15 : i1 to i32
    %c0_i32_10 = arith.constant 0 : i32
    %17 = arith.cmpi ne, %16, %c0_i32_10 : i32
    scf.if %17 {
      %c0_11 = arith.constant 0 : index
      %c0_12 = arith.constant 0 : index
      %18 = vector.load %arg8[%c0_11, %c0_12] : memref<128x128xf32, #tpu.memory_space<vmem>>, vector<128x128xf32>
      %19 = arith.truncf %18 : vector<128x128xf32> to vector<128x128xbf16>
      %c0_13 = arith.constant 0 : index
      %c0_14 = arith.constant 0 : index
      %c0_15 = arith.constant 0 : index
      %20 = vector.load %arg5[%c0_13, %c0_14, %c0_15] : memref<1x128x128xbf16, #tpu.memory_space<vmem>>, vector<1x128x128xbf16>
      %21 = vector.shape_cast %20 : vector<1x128x128xbf16> to vector<128x128xbf16>
      %cst_16 = arith.constant dense<0.000000e+00> : vector<128x128xf32>
      %22 = tpu.matmul %19, %21, %cst_16 {dimension_numbers = #tpu.dot_dimension_numbers<[1], [0], [0], [1], [0, 0, 1, 1], [], []>} : vector<128x128xbf16>, vector<128x128xbf16>, vector<128x128xf32> -> vector<128x128xf32>
      %c0_17 = arith.constant 0 : index
      %c0_18 = arith.constant 0 : index
      %c0_19 = arith.constant 0 : index
      %23 = vector.load %arg6[%c0_17, %c0_18, %c0_19] : memref<1x1x128xf32, #tpu.memory_space<vmem>>, vector<1x1x128xf32>
      %24 = vector.shape_cast %23 : vector<1x1x128xf32> to vector<1x128xf32>
      %25 = vector.broadcast %24 : vector<1x128xf32> to vector<128x128xf32>
      %26 = arith.addf %22, %25 : vector<128x128xf32>
      %c0_20 = arith.constant 0 : index
      %c0_21 = arith.constant 0 : index
      %c0_22 = arith.constant 0 : index
      %27 = vector.load %arg7[%c0_20, %c0_21, %c0_22] : memref<1x128x128xf32, #tpu.memory_space<vmem>>, vector<1x128x128xf32>
      %28 = vector.shape_cast %27 : vector<1x128x128xf32> to vector<128x128xf32>
      %29 = vector.shape_cast %26 : vector<128x128xf32> to vector<1x128x128xf32>
      tpu.vector_store %arg7[%c0_20, %c0_21, %c0_22], %29 {strides = array<i32>} : memref<1x128x128xf32, #tpu.memory_space<vmem>>, vector<1x128x128xf32>,
    } else {
    }
    return
  }
  func.func @transform_0(%arg0: i32, %arg1: i32, %arg2: i32) -> (i32, i32, i32) {
    %c0_i32 = arith.constant 0 : i32
    return %arg0, %arg1, %arg2 : i32, i32, i32
  }
  func.func @transform_1(%arg0: i32, %arg1: i32, %arg2: i32) -> (i32, i32, i32) {
    %c0_i32 = arith.constant 0 : i32
    %c0_i32_0 = arith.constant 0 : i32
    %c0_i32_1 = arith.constant 0 : i32
    return %arg0, %c0_i32, %c0_i32_0 : i32, i32, i32
  }
  func.func @transform_2(%arg0: i32, %arg1: i32, %arg2: i32) -> (i32, i32, i32) {
    %c0_i32 = arith.constant 0 : i32
    %c0_i32_0 = arith.constant 0 : i32
    %c0_i32_1 = arith.constant 0 : i32
    return %arg0, %c0_i32, %c0_i32_0 : i32, i32, i32
  }
  func.func @transform_3(%arg0: i32, %arg1: i32, %arg2: i32) -> (i32, i32, i32) {
    %c0_i32 = arith.constant 0 : i32
    %c0_i32_0 = arith.constant 0 : i32
    %c0_i32_1 = arith.constant 0 : i32
    return %arg0, %c0_i32, %c0_i32_0 : i32, i32, i32
  }
  func.func @transform_4(%arg0: i32, %arg1: i32, %arg2: i32) -> (i32, i32, i32) {
    %c0_i32 = arith.constant 0 : i32
    %c0_i32_0 = arith.constant 0 : i32
    return %arg0, %arg1, %c0_i32 : i32, i32, i32
  }
}

</mosaic_0001>

<bundles_post_ra>
// kernel: egcn_apply.3
= control target key start
LH: loop header
LB: loop body
LE: loop exit
PB: predicated region body
PF: predicated region fallthrough
CT: control target
= control target key end

     0   :  { %s648_s0 = inlined_call_operand.vmem [shape: s8[1,128,128], index: 0, kind: input, shape index: {}]   ;;  %s649_s1 = inlined_call_operand.vmem [shape: bf16[1,128,128], index: 1, kind: input, shape index: {}]   ;;  %s650_s2 = inlined_call_operand.vmem [shape: bf16[1,128,128], index: 2, kind: input, shape index: {}]   ;;  %s651_s3 = inlined_call_operand.vmem [shape: f32[1,1,128], index: 3, kind: input, shape index: {}]   ;;  %s652_s4 = inlined_call_operand.hbm [shape: f32[1,128,128], index: 4, kind: output, shape index: {}]  }
   0x1   :  { %v499_v0 = vld [vmem:[%s649_s1 + $0x38] sm:$0xff]  ;;  %v498_v1 = vld [vmem:[%s649_s1 + $0x30] sm:$0xff] }
   0x2   :  { %167 = vmatpush.bf16.msra.mxu0 %v499_v0  ;;  %508 = vmatpush.bf16.msra.mxu2 %v499_v0 }
   0x3   :  { %9 = vsyncpa [#allocation4], 0  ;;  %v497_v2 = vld [vmem:[%s649_s1 + $0x28] sm:$0xff]  ;;  %v496_v3 = vld [vmem:[%s649_s1 + $0x20] sm:$0xff]  ;;  %s414_s5 = sshll.u32 %s652_s4, 4  ;;  %s555_s6 = smov 128   ;;  %s415_s5 = int_to_ptr.hbm [resolvable:$true] %s414_s5 }
   0x4   :  { %v495_v4 = vld [vmem:[%s649_s1 + $0x18] sm:$0xff]  ;;  %v494_v5 = vld [vmem:[%s649_s1 + $0x10] sm:$0xff]  ;;  %v38_v6 = vld [vmem:[%s648_s0] sm:$0xff]  ;;  %s556_s7 = smov 8  }
   0x5   :  { %v40_v7 = vld [vmem:[%s648_s0 + $0x10] sm:$0xff]  ;;  %v42_v8 = vunpack.c.0.s8 %v38_v6  ;;  %v43_v9 = vunpack.c.1.s8 %v38_v6  ;;  %v493_v12 = vld [vmem:[%s649_s1 + $0x8] sm:$0xff]  ;;  %v492_v17 = vld [vmem:[%s649_s1] sm:$0xff]  ;;  %v44_v20 = vunpack.c.2.s8 %v38_v6  ;;  %v45_v21 = vunpack.c.3.s8 %v38_v6 }
   0x6   :  { %168 = vmatpush.bf16.msra.mxu0 %v498_v1  ;;  %509 = vmatpush.bf16.msra.mxu2 %v498_v1  ;;  %v50_v10 = vunpack.c.0.s8 %v40_v7  ;;  %v51_v11 = vunpack.c.1.s8 %v40_v7  ;;  %v52_v22 = vunpack.c.2.s8 %v40_v7  ;;  %v53_v23 = vunpack.c.3.s8 %v40_v7  ;;  %v507_v30 = vld [vmem:[%s650_s2 + $0x38] sm:$0xff]  ;;  %v39_v31 = vld [vmem:[%s648_s0 + $0x8] sm:$0xff]  ;;  %v506_v33 = vld [vmem:[%s650_s2 + $0x30] sm:$0xff] }
   0x7   :  { %v58_v13 = vcvt.s32.f32 %v42_v8  ;;  %v59_v14 = vcvt.s32.f32 %v43_v9  ;;  %v60_v24 = vcvt.s32.f32 %v44_v20  ;;  %v61_v25 = vcvt.s32.f32 %v45_v21  ;;  %v41_v32 = vld [vmem:[%s648_s0 + $0x18] sm:$0xff]  ;;  %343 = vmatpush.bf16.msra.mxu1 %v507_v30  ;;  %516 = vmatpush.bf16.msra.mxu3 %v507_v30  ;;  %v505_v38 = vld [vmem:[%s650_s2 + $0x28] sm:$0xff]  ;;  %v504_v43 = vld [vmem:[%s650_s2 + $0x20] sm:$0xff] }
   0x8   :  { %v66_v15 = vcvt.s32.f32 %v50_v10  ;;  %v67_v16 = vcvt.s32.f32 %v51_v11  ;;  %v68_v26 = vcvt.s32.f32 %v52_v22  ;;  %v69_v27 = vcvt.s32.f32 %v53_v23  ;;  %v503_v46 = vld [vmem:[%s650_s2 + $0x18] sm:$0xff]  ;;  %v502_v57 = vld [vmem:[%s650_s2 + $0x10] sm:$0xff]  ;;  %v501_v58 = vld [vmem:[%s650_s2 + $0x8] sm:$0xff] }
   0x9   :  { %v74_v18 = vpack.c.bf16 %v59_v14, %v58_v13  ;;  %v75_v28 = vpack.c.bf16 %v61_v25, %v60_v24  ;;  %v46_v34 = vunpack.c.0.s8 %v39_v31  ;;  %v47_v35 = vunpack.c.1.s8 %v39_v31  ;;  %v500_v59 = vld [vmem:[%s650_s2] sm:$0xff] }
   0xa   :  { %169 = vmatpush.bf16.msra.mxu0 %v497_v2  ;;  %510 = vmatpush.bf16.msra.mxu2 %v497_v2  ;;  %v78_v19 = vpack.c.bf16 %v67_v16, %v66_v15  ;;  %v79_v29 = vpack.c.bf16 %v69_v27, %v68_v26  ;;  %v54_v36 = vunpack.c.0.s8 %v41_v32  ;;  %v55_v37 = vunpack.c.1.s8 %v41_v32  ;;  %v527_v20 = vld [vmem:[%s651_s3] ss:$0 sm:$0xff]  ;;  %s554_s3 = smov [#allocation3]  }
   0xb   :  { %344 = vmatpush.bf16.msra.mxu1 %v506_v33  ;;  %517 = vmatpush.bf16.msra.mxu3 %v506_v33  ;;  %v62_v39 = vcvt.s32.f32 %v46_v34  ;;  %v63_v40 = vcvt.s32.f32 %v47_v35  ;;  %v48_v47 = vunpack.c.2.s8 %v39_v31  ;;  %v49_v48 = vunpack.c.3.s8 %v39_v31  ;;  %s412_s28 = sshll.u32 %s554_s3, 4  ;;  %s413_s28 = int_to_ptr.vmem [resolvable:$true] %s412_s28 }
   0xc   :  { %v70_v41 = vcvt.s32.f32 %v54_v36  ;;  %v71_v42 = vcvt.s32.f32 %v55_v37  ;;  %v56_v49 = vunpack.c.2.s8 %v41_v32  ;;  %v57_v50 = vunpack.c.3.s8 %v41_v32 }
   0xd   :  { %v76_v44 = vpack.c.bf16 %v63_v40, %v62_v39  ;;  %v64_v51 = vcvt.s32.f32 %v48_v47  ;;  %v65_v52 = vcvt.s32.f32 %v49_v48 }
   0xe   :  { %170 = vmatpush.bf16.msra.mxu0 %v496_v3  ;;  %511 = vmatpush.bf16.msra.mxu2 %v496_v3  ;;  %v80_v45 = vpack.c.bf16 %v71_v42, %v70_v41  ;;  %v72_v53 = vcvt.s32.f32 %v56_v49  ;;  %v73_v54 = vcvt.s32.f32 %v57_v50 }
   0xf   :  { %345 = vmatpush.bf16.msra.mxu1 %v505_v38  ;;  %518 = vmatpush.bf16.msra.mxu3 %v505_v38  ;;  %v77_v55 = vpack.c.bf16 %v65_v52, %v64_v51 }
  0x10   :  { %v81_v56 = vpack.c.bf16 %v73_v54, %v72_v53 }
  0x12   :  { %171 = vmatpush.bf16.msra.mxu0 %v495_v4  ;;  %512 = vmatpush.bf16.msra.mxu2 %v495_v4 }
  0x13   :  { %346 = vmatpush.bf16.msra.mxu1 %v504_v43  ;;  %519 = vmatpush.bf16.msra.mxu3 %v504_v43 }
  0x16   :  { %172 = vmatpush.bf16.msra.mxu0 %v494_v5  ;;  %513 = vmatpush.bf16.msra.mxu2 %v494_v5 }
  0x17   :  { %347 = vmatpush.bf16.msra.mxu1 %v503_v46  ;;  %520 = vmatpush.bf16.msra.mxu3 %v503_v46 }
  0x1a   :  { %173 = vmatpush.bf16.msra.mxu0 %v493_v12  ;;  %514 = vmatpush.bf16.msra.mxu2 %v493_v12 }
  0x1b   :  { %348 = vmatpush.bf16.msra.mxu1 %v502_v57  ;;  %521 = vmatpush.bf16.msra.mxu3 %v502_v57 }
  0x1e   :  { %174 = vmatpush.bf16.msra.mxu0 %v492_v17  ;;  %515 = vmatpush.bf16.msra.mxu2 %v492_v17 }
  0x1f   :  { %349 = vmatpush.bf16.msra.mxu1 %v501_v58  ;;  %522 = vmatpush.bf16.msra.mxu3 %v501_v58 }
  0x21   :  { %175 = vmatmul.bf16.vlgmr.msra.gmra.mxu0 %v74_v18  ;;  %195 = vmatmul.bf16.vlgmr.msra.gmra.mxu2 %v78_v19 }
  0x23   :  { %350 = vmatpush.bf16.msra.mxu1 %v500_v59  ;;  %523 = vmatpush.bf16.msra.mxu3 %v500_v59 }
  0x31   :  { %180 = vmatmul.bf16.gmra.mxu0 %v75_v28  ;;  %200 = vmatmul.bf16.gmra.mxu2 %v79_v29 }
  0x41   :  { %185 = vmatmul.bf16.gmra.mxu0 %v76_v44  ;;  %205 = vmatmul.bf16.gmra.mxu2 %v80_v45 }
  0x51   :  { %190 = vmatmul.bf16.gmra.mxu0 %v77_v55  ;;  %210 = vmatmul.bf16.gmra.mxu2 %v81_v56 }
  0x9e   :  { %v176_v60 = vpop.f32.mrf.mxu0 }
  0xa4   :  { %v196_v61 = vpop.f32.mrf.mxu2 }
  0xa6   :  { %v178_v62 = vpop.f32.mrf.mxu0 }
  0xa7   :  { %v267_v63 = vpack.c.bf16 %v178_v62, %v176_v60 }
  0xa9   :  { %351 = vmatmul.bf16.vlgmr.msra.gmra.mxu1 %v267_v63 }
  0xac   :  { %v198_v0 = vpop.f32.mrf.mxu2 }
  0xad   :  { %v271_v1 = vpack.c.bf16 %v198_v0, %v196_v61 }
  0xae   :  { %v181_v2 = vpop.f32.mrf.mxu0 }
  0xaf   :  { %371 = vmatmul.bf16.vlgmr.msra.gmra.mxu3 %v271_v1 }
  0xb4   :  { %v201_v3 = vpop.f32.mrf.mxu2 }
  0xb6   :  { %v183_v4 = vpop.f32.mrf.mxu0 }
  0xb7   :  { %v268_v5 = vpack.c.bf16 %v183_v4, %v181_v2 }
  0xb9   :  { %356 = vmatmul.bf16.gmra.mxu1 %v268_v5 }
  0xbc   :  { %v203_v6 = vpop.f32.mrf.mxu2 }
  0xbd   :  { %v272_v7 = vpack.c.bf16 %v203_v6, %v201_v3 }
  0xbe   :  { %v186_v8 = vpop.f32.mrf.mxu0 }
  0xbf   :  { %376 = vmatmul.bf16.gmra.mxu3 %v272_v7 }
  0xc4   :  { %v206_v9 = vpop.f32.mrf.mxu2 }
  0xc6   :  { %v188_v10 = vpop.f32.mrf.mxu0 }
  0xc7   :  { %v269_v11 = vpack.c.bf16 %v188_v10, %v186_v8 }
  0xc9   :  { %361 = vmatmul.bf16.gmra.mxu1 %v269_v11 }
  0xcc   :  { %v208_v12 = vpop.f32.mrf.mxu2 }
  0xcd   :  { %v273_v13 = vpack.c.bf16 %v208_v12, %v206_v9 }
  0xce   :  { %v191_v14 = vpop.f32.mrf.mxu0 }
  0xcf   :  { %381 = vmatmul.bf16.gmra.mxu3 %v273_v13 }
  0xd4   :  { %v211_v15 = vpop.f32.mrf.mxu2 }
  0xd6   :  { %v193_v16 = vpop.f32.mrf.mxu0 }
  0xd7   :  { %v270_v17 = vpack.c.bf16 %v193_v16, %v191_v14 }
  0xd9   :  { %366 = vmatmul.bf16.gmra.mxu1 %v270_v17 }
  0xdc   :  { %v213_v18 = vpop.f32.mrf.mxu2 }
  0xdd   :  { %v274_v19 = vpack.c.bf16 %v213_v18, %v211_v15 }
  0xdf   :  { %386 = vmatmul.bf16.gmra.mxu3 %v274_v19 }
 0x126   :  { %v352_v21 = vpop.f32.mrf.mxu1 }
 0x127   :  { %v353_v22 = vadd.f32 %v527_v20, %v352_v21 }
 0x129   :  { %392 = vst [vmem:[#allocation3] sm:$0xff] %v353_v22 }
 0x12e   :  { %v354_v23 = vpop.f32.mrf.mxu1 }
 0x12f   :  { %v355_v24 = vadd.f32 %v527_v20, %v354_v23 }
 0x131   :  { %393 = vst [vmem:[#allocation3 + $0x8] sm:$0xff] %v355_v24 }
 0x132   :  { %v372_v25 = vpop.f32.mrf.mxu3 }
 0x133   :  { %v373_v26 = vadd.f32 %v527_v20, %v372_v25 }
 0x135   :  { %400 = vst [vmem:[#allocation3 + $0x40] sm:$0xff] %v373_v26 }
 0x136   :  { %v357_v27 = vpop.f32.mrf.mxu1 }
 0x137   :  { %v358_v28 = vadd.f32 %v527_v20, %v357_v27 }
 0x139   :  { %394 = vst [vmem:[#allocation3 + $0x10] sm:$0xff] %v358_v28 }
 0x13a   :  { %v374_v29 = vpop.f32.mrf.mxu3 }
 0x13b   :  { %v375_v30 = vadd.f32 %v527_v20, %v374_v29 }
 0x13d   :  { %401 = vst [vmem:[#allocation3 + $0x48] sm:$0xff] %v375_v30 }
 0x13e   :  { %v359_v31 = vpop.f32.mrf.mxu1 }
 0x13f   :  { %v360_v32 = vadd.f32 %v527_v20, %v359_v31 }
 0x141   :  { %395 = vst [vmem:[#allocation3 + $0x18] sm:$0xff] %v360_v32 }
 0x142   :  { %v377_v33 = vpop.f32.mrf.mxu3 }
 0x143   :  { %v378_v34 = vadd.f32 %v527_v20, %v377_v33 }
 0x145   :  { %402 = vst [vmem:[#allocation3 + $0x50] sm:$0xff] %v378_v34 }
 0x146   :  { %v362_v35 = vpop.f32.mrf.mxu1 }
 0x147   :  { %v363_v36 = vadd.f32 %v527_v20, %v362_v35 }
 0x149   :  { %396 = vst [vmem:[#allocation3 + $0x20] sm:$0xff] %v363_v36 }
 0x14a   :  { %v379_v37 = vpop.f32.mrf.mxu3 }
 0x14b   :  { %v380_v38 = vadd.f32 %v527_v20, %v379_v37 }
 0x14d   :  { %403 = vst [vmem:[#allocation3 + $0x58] sm:$0xff] %v380_v38 }
 0x14e   :  { %v364_v39 = vpop.f32.mrf.mxu1 }
 0x14f   :  { %v365_v40 = vadd.f32 %v527_v20, %v364_v39 }
 0x151   :  { %397 = vst [vmem:[#allocation3 + $0x28] sm:$0xff] %v365_v40 }
 0x152   :  { %v382_v41 = vpop.f32.mrf.mxu3 }
 0x153   :  { %v383_v42 = vadd.f32 %v527_v20, %v382_v41 }
 0x155   :  { %404 = vst [vmem:[#allocation3 + $0x60] sm:$0xff] %v383_v42 }
 0x156   :  { %v367_v43 = vpop.f32.mrf.mxu1 }
 0x157   :  { %v368_v44 = vadd.f32 %v527_v20, %v367_v43 }
 0x159   :  { %398 = vst [vmem:[#allocation3 + $0x30] sm:$0xff] %v368_v44 }
 0x15a   :  { %v384_v45 = vpop.f32.mrf.mxu3 }
 0x15b   :  { %v385_v46 = vadd.f32 %v527_v20, %v384_v45 }
 0x15d   :  { %405 = vst [vmem:[#allocation3 + $0x68] sm:$0xff] %v385_v46 }
 0x15e   :  { %v369_v47 = vpop.f32.mrf.mxu1 }
 0x15f   :  { %v370_v48 = vadd.f32 %v527_v20, %v369_v47 }
 0x161   :  { %399 = vst [vmem:[#allocation3 + $0x38] sm:$0xff] %v370_v48 }
 0x162   :  { %v387_v49 = vpop.f32.mrf.mxu3 }
 0x163   :  { %v388_v50 = vadd.f32 %v527_v20, %v387_v49 }
 0x165   :  { %406 = vst [vmem:[#allocation3 + $0x70] sm:$0xff] %v388_v50 }
 0x16a   :  { %v389_v51 = vpop.f32.mrf.mxu3 }
 0x16b   :  { %v390_v52 = vadd.f32 %v527_v20, %v389_v51 }
 0x16d   :  { %407 = vst [vmem:[#allocation3 + $0x78] sm:$0xff] %v390_v52 }
 0x16e   :  { %420 = dma.vmem_to_hbm [thread:$0]  %s413_s28, 2048, %s415_s5, [#allocation4], %s555_s6, %s555_s6, %s556_s7  }
 0x16f   :  { %552 = dma.done.wait [#allocation4], 2048  }
 0x170   :  { %553 = vsyncadd [#allocation4], 4294965248 }
 0x171   :  { %425 = vsyncpa [#allocation4], 1 }

// kernel: egcn_apply.2
= control target key start
LH: loop header
LB: loop body
LE: loop exit
PB: predicated region body
PF: predicated region fallthrough
CT: control target
= control target key end

     0   :  { %s1575_s0 = inlined_call_operand.hbm [shape: s8[3,128,128], index: 0, kind: input, shape index: {}]   ;;  %s1576_s1 = inlined_call_operand.hbm [shape: bf16[3,128,128], index: 1, kind: input, shape index: {}]   ;;  %s1577_s2 = inlined_call_operand.hbm [shape: bf16[3,128,128], index: 2, kind: input, shape index: {}]   ;;  %s1578_s3 = inlined_call_operand.hbm [shape: f32[3,1,128], index: 3, kind: input, shape index: {}]   ;;  %s1579_s4 = inlined_call_operand.vmem [shape: bf16[3,128,128], index: 4, kind: output, shape index: {}]  }
   0x1   :  { %1582 = sst [smem:[#allocation15_spill]] %s1576_s1 }
   0x2   :  { %1583 = sst [smem:[#allocation16_spill]] %s1577_s2 }
   0x3   :  { %9 = vsyncpa [#allocation4], 0 }
   0x4   :  { %11 = vsyncpa [#allocation4 + $0x1], 0 }
   0x5   :  { %12 = vsyncpa [#allocation6], 0 }
   0x6   :  { %14 = vsyncpa [#allocation6 + $0x1], 0 }
   0x7   :  { %15 = vsyncpa [#allocation9], 0 }
   0x8   :  { %17 = vsyncpa [#allocation9 + $0x1], 0  ;;  %s1395_s15 = smov 0   ;;  %s1397_s16 = smov 0  }
   0x9   :  { %s1399_s17 = smov 0   ;;  %s1401_s18 = smov 0  }
   0xa   :  { %s1403_s19 = smov 0   ;;  %s1405_s20 = smov 0  }
   0xb LB: > { %s1580_s21 = sadd.s32 4294967295, %s1364_s20   ;;  %s42_s22 = sadd.s32 1, %s1360_s19  ;;  %s1364_s20 = sphi %s1405_s20, %s23_s20   ;;  %s1360_s19 = sphi %s1403_s19, %s1598_s19   ;;  %s1356_s18 = sphi %s1401_s18, %s1597_s18   ;;  %s1352_s17 = sphi %s1399_s17, %s1596_s17   ;;  %s1348_s16 = sphi %s1397_s16, %s1595_s16   ;;  %s1344_s15 = sphi %s1395_s15, %s1594_s15  }
   0xc   : > { %p44_p0 = scmp.ge.s32.totalorder %s42_s22, 3  ;;  %s53_s23 = sadd.s32 1, %s1352_s17 }
   0xd   : > { %p60_p1 = scmp.ne.s32.totalorder %s1352_s17, %s1348_s16  ;;  %p61_p2 = scmp.eq.s32.totalorder %s1364_s20, 0 }
   0xe   : > { %s1600_s22 = smov (%p44_p0, %s42_s22), 0  ;;  %p66_p4 = scmp.ne.s32.totalorder %s1348_s16, %s1344_s15 }
   0xf   : > { %1584 = sst [smem:[#allocation13_spill]] %s1600_s22  ;;  %p62_p3 = por %p61_p2, %p60_p1 }
  0x10   : > { %s46_s24 = ssub.s32 %s1360_s19, %s1600_s22  ;;  %p67_p5 = scmp.eq.s32.totalorder %s1580_s21, 0 }
  0x11   : > { %p51_p6 = scmp.eq.s32.totalorder %s46_s24, 0  ;;  %p1132_p8 = scmp.lt.s32.totalorder %s1364_s20, 3 }
  0x12   : > { %p1436_p7 = por %p67_p5, %p66_p4  ;;  %s1445_s27 = sand.u32 1, %s1352_s17  }
  0x13   : > { %s1442_s26 = scalar_select %p51_p6, %s1352_s17, %s53_s23  }
  0x14   : > { %p1447_p9 = pnand %p1132_p8, %p62_p3  ;;  %s221_s29 = sand.u32 1, %s1364_s20  }
  0x15   : > { %1586 = sst [smem:[#allocation14_spill]] %s1442_s26  ;;  %s950_s30 = sshll.u32 %s1445_s27, 6 }
  0x16   : > { %s1029_s5 = sshll.u32 %s1360_s19, 6  ;;  %s1588_s1 = sld [smem:[#allocation15_spill]] }
  0x17   : > { %s225_s9 = scalar_lea.vmem [#allocation5], %s950_s30  ;;  %s1457_s12 = scalar_lea.sflag [#allocation6], %s221_s29 }
  0x18   : > { %s233_s10 = sshll.u32 %s225_s9, 4  ;;  %s1366_s13 = smov 64   ;;  %s234_s10 = int_to_ptr.vmem [resolvable:$true] %s233_s10 }
  0x19   : > { %s1367_s14 = smov 4   ;;  %s1589_s2 = sld [smem:[#allocation16_spill]] }
  0x1a   : > { %s247_s6 = scalar_lea.vmem [#allocation7], %s950_s30  ;;  %p956_p10 = scmp.ge.s32.totalorder %s1364_s20, 1 }
  0x1b   : > { %s255_s7 = sshll.u32 %s247_s6, 4  ;;  %p280_p11 = scmp.lt.s32.totalorder %s1364_s20, 4  ;;  %s256_s7 = int_to_ptr.vmem [resolvable:$true] %s255_s7 }
  0x1c   : > { %s230_s8 = scalar_lea.hbm %s1588_s1, %s1029_s5  ;;  %s197_s6 = scalar_lea.sflag [#allocation4], %s1445_s27 }
  0x1d   : > { %s231_s11 = sshll.u32 %s230_s8, 4  ;;  %p1467_p12 = pnand %p956_p10, %p280_p11  ;;  %s232_s11 = int_to_ptr.hbm [resolvable:$true] %s231_s11 }
  0x1e   : > { %1125 = dma.hbm_to_vmem [thread:$0]  (!%p1447_p9), %s232_s11, 1024, %s234_s10, %s1457_s12, %s1366_s13, %s1366_s13, %s1367_s14  }
  0x1f   : > { %s252_s24 = scalar_lea.hbm %s1589_s2, %s1029_s5  ;;  %s947_s8 = sshll.u32 %s1445_s27, 5 }
  0x20   : > { %s253_s9 = sshll.u32 %s252_s24, 4  ;;  %s1028_s10 = sshll.u32 %s1360_s19, 5  ;;  %s254_s9 = int_to_ptr.hbm [resolvable:$true] %s253_s9 }
  0x21   : > { %s208_s11 = scalar_lea.hbm %s1575_s0, %s1028_s10  ;;  %s200_s15 = scalar_lea.vmem [#allocation3], %s947_s8 }
  0x22   : > { %s211_s23 = sshll.u32 %s200_s15, 4  ;;  %s209_s24 = sshll.u32 %s208_s11, 4  ;;  %s212_s23 = int_to_ptr.vmem [resolvable:$true] %s211_s23  ;;  %s210_s24 = int_to_ptr.hbm [resolvable:$true] %s209_s24 }
  0x23   : > { %s1368_s21 = smov 128   ;;  %s1369_s1 = smov 8  }
  0x24   : > { %1122 = dma.hbm_to_vmem [thread:$0]  (!%p1447_p9), %s210_s24, 512, %s212_s23, %s197_s6, %s1368_s21, %s1368_s21, %s1369_s1  }
  0x25   : > { %1128 = dma.hbm_to_vmem [thread:$0]  (!%p1447_p9), %s254_s9, 1024, %s256_s7, %s1457_s12, %s1366_s13, %s1366_s13, %s1367_s14  }
  0x26   : > { %s271_s26 = scalar_lea.hbm %s1578_s3, %s1360_s19  ;;  %s268_s10 = scalar_lea.vmem [#allocation8], %s1445_s27 }
  0x27   : > { %s273_s5 = sshll.u32 %s271_s26, 4  ;;  %s275_s8 = sshll.u32 %s268_s10, 4  ;;  %s274_s5 = int_to_ptr.hbm [resolvable:$true] %s273_s5  ;;  %s276_s8 = int_to_ptr.vmem [resolvable:$true] %s275_s8 }
  0x28   : > { %s266_s30 = scalar_lea.sflag [#allocation9], %s1445_s27  ;;  %284 = sbr.rel (%p1467_p12) target bundleno = 420 (0x1a4), region = 36 }
  0x29   : > { %1131 = dma.hbm_to_vmem [thread:$0]  (!%p1447_p9), %s274_s5, 16, %s276_s8, %s266_s30  }
  0x2a   : > { %s1493_s1 = sand.u32 (!%p1467_p12), 1, %s1348_s16  }
  0x2b   : > { %s957_s21 = sshll.u32 (!%p1467_p12), %s1493_s1, 5  ;;  %s287_s2 = scalar_lea.sflag (!%p1467_p12), [#allocation4], %s1493_s1 }
  0x2c   : > { %s1497_s22 = scalar_lea.vmem (!%p1467_p12), [#allocation3], %s957_s21 }
  0x2d   : > { %1331 = dma.done.wait (%p1436_p7), %s287_s2, 512  }
  0x2e   : > { %1333 = vsyncadd (%p1436_p7), %s287_s2, 4294966784  ;;  %s1591_s26 = sadd.s32 4294967295, %s1364_s20   ;;  %s958_s28 = sshll.u32 %s1493_s1, 6 }
  0x2f   : > { %s296_s27 = sand.u32 1, %s1591_s26   ;;  %s1506_s13 = scalar_lea.vmem [#allocation5], %s958_s28 }
  0x30   : > { %s297_s12 = scalar_lea.sflag [#allocation6], %s296_s27 }
  0x31   : > { %1335 = dma.done.wait (%p1436_p7), %s297_s12, 2048  }
  0x32   : > { %1337 = vsyncadd (%p1436_p7), %s297_s12, 4294965248  ;;  %s1512_s14 = scalar_lea.vmem [#allocation7], %s958_s28  ;;  %s317_s7 = scalar_lea.sflag [#allocation9], %s1493_s1 }
  0x33   : > { %s319_s9 = scalar_lea.vmem [#allocation8], %s1493_s1 }
  0x34   : > { %1339 = dma.done.wait (%p1436_p7), %s317_s7, 16  }
  0x35   : > { %1341 = vsyncadd (%p1436_p7), %s317_s7, 4294967280  ;;  %v1039_v0 = vld [vmem:[%s1506_s13 + $0x38] sm:$0xff]  ;;  %v1038_v1 = vld [vmem:[%s1506_s13 + $0x30] sm:$0xff]  ;;  %p365_p13 = scmp.lt.s32.totalorder %s1356_s18, 2 }
  0x36   : > { %523 = vmatpush.bf16.msra.mxu0 %v1039_v0  ;;  %1095 = vmatpush.bf16.msra.mxu2 %v1039_v0  ;;  %v1037_v2 = vld [vmem:[%s1506_s13 + $0x28] sm:$0xff]  ;;  %v1036_v3 = vld [vmem:[%s1506_s13 + $0x20] sm:$0xff]  ;;  %v1035_v4 = vld [vmem:[%s1506_s13 + $0x18] sm:$0xff] }
  0x37   : > { %v1034_v5 = vld [vmem:[%s1506_s13 + $0x10] sm:$0xff]  ;;  %v394_v6 = vld [vmem:[%s1497_s22] sm:$0xff]  ;;  %v1033_v12 = vld [vmem:[%s1506_s13 + $0x8] sm:$0xff]  ;;  %s1602_s18 = smov (!%p365_p13, %s1356_s18), 2 }
  0x38   : > { %v396_v7 = vld [vmem:[%s1497_s22 + $0x10] sm:$0xff]  ;;  %v398_v8 = vunpack.c.0.s8 %v394_v6  ;;  %v399_v9 = vunpack.c.1.s8 %v394_v6  ;;  %v1032_v17 = vld [vmem:[%s1506_s13] sm:$0xff]  ;;  %v400_v20 = vunpack.c.2.s8 %v394_v6  ;;  %v401_v21 = vunpack.c.3.s8 %v394_v6  ;;  %v1047_v30 = vld [vmem:[%s1512_s14 + $0x38] sm:$0xff]  ;;  %s1031_s25 = sshll.u32 %s1602_s18, 6 }
  0x39   : > { %v406_v10 = vunpack.c.0.s8 %v396_v7  ;;  %v407_v11 = vunpack.c.1.s8 %v396_v7  ;;  %v408_v22 = vunpack.c.2.s8 %v396_v7  ;;  %v409_v23 = vunpack.c.3.s8 %v396_v7  ;;  %v395_v31 = vld [vmem:[%s1497_s22 + $0x8] sm:$0xff]  ;;  %v397_v32 = vld [vmem:[%s1497_s22 + $0x18] sm:$0xff]  ;;  %699 = vmatpush.bf16.msra.mxu1 %v1047_v30  ;;  %v1046_v33 = vld [vmem:[%s1512_s14 + $0x30] sm:$0xff]  ;;  %1103 = vmatpush.bf16.msra.mxu3 %v1047_v30  ;;  %s1547_s15 = scalar_lea.vmem %s1579_s4, %s1031_s25 }
  0x3a   : > { %524 = vmatpush.bf16.msra.mxu0 %v1038_v1  ;;  %1096 = vmatpush.bf16.msra.mxu2 %v1038_v1  ;;  %v414_v13 = vcvt.s32.f32 %v398_v8  ;;  %v415_v14 = vcvt.s32.f32 %v399_v9  ;;  %v416_v24 = vcvt.s32.f32 %v400_v20  ;;  %v417_v25 = vcvt.s32.f32 %v401_v21  ;;  %v1045_v38 = vld [vmem:[%s1512_s14 + $0x28] sm:$0xff]  ;;  %v1044_v43 = vld [vmem:[%s1512_s14 + $0x20] sm:$0xff]  ;;  %v1043_v46 = vld [vmem:[%s1512_s14 + $0x18] sm:$0xff] }
  0x3b   : > { %v422_v15 = vcvt.s32.f32 %v406_v10  ;;  %v423_v16 = vcvt.s32.f32 %v407_v11  ;;  %v424_v26 = vcvt.s32.f32 %v408_v22  ;;  %v425_v27 = vcvt.s32.f32 %v409_v23  ;;  %v1042_v57 = vld [vmem:[%s1512_s14 + $0x10] sm:$0xff]  ;;  %v1041_v58 = vld [vmem:[%s1512_s14 + $0x8] sm:$0xff]  ;;  %v1040_v59 = vld [vmem:[%s1512_s14] sm:$0xff] }
  0x3c   : > { %v430_v18 = vpack.c.bf16 %v415_v14, %v414_v13  ;;  %v431_v28 = vpack.c.bf16 %v417_v25, %v416_v24  ;;  %v402_v34 = vunpack.c.0.s8 %v395_v31  ;;  %v403_v35 = vunpack.c.1.s8 %v395_v31  ;;  %v1185_v21 = vld [vmem:[%s319_s9] ss:$0 sm:$0xff] }
  0x3d   : > { %v434_v19 = vpack.c.bf16 %v423_v16, %v422_v15  ;;  %v435_v29 = vpack.c.bf16 %v425_v27, %v424_v26  ;;  %v410_v36 = vunpack.c.0.s8 %v397_v32  ;;  %v411_v37 = vunpack.c.1.s8 %v397_v32  ;;  %700 = vmatpush.bf16.msra.mxu1 %v1046_v33  ;;  %1104 = vmatpush.bf16.msra.mxu3 %v1046_v33 }
  0x3e   : > { %525 = vmatpush.bf16.msra.mxu0 %v1037_v2  ;;  %1097 = vmatpush.bf16.msra.mxu2 %v1037_v2  ;;  %v418_v39 = vcvt.s32.f32 %v402_v34  ;;  %v419_v40 = vcvt.s32.f32 %v403_v35  ;;  %v404_v47 = vunpack.c.2.s8 %v395_v31  ;;  %v405_v48 = vunpack.c.3.s8 %v395_v31 }
  0x3f   : > { %v426_v41 = vcvt.s32.f32 %v410_v36  ;;  %v427_v42 = vcvt.s32.f32 %v411_v37  ;;  %v412_v49 = vunpack.c.2.s8 %v397_v32  ;;  %v413_v50 = vunpack.c.3.s8 %v397_v32 }
  0x40   : > { %v432_v44 = vpack.c.bf16 %v419_v40, %v418_v39  ;;  %v420_v51 = vcvt.s32.f32 %v404_v47  ;;  %v421_v52 = vcvt.s32.f32 %v405_v48 }
  0x41   : > { %701 = vmatpush.bf16.msra.mxu1 %v1045_v38  ;;  %1105 = vmatpush.bf16.msra.mxu3 %v1045_v38  ;;  %v436_v45 = vpack.c.bf16 %v427_v42, %v426_v41  ;;  %v428_v53 = vcvt.s32.f32 %v412_v49  ;;  %v429_v54 = vcvt.s32.f32 %v413_v50 }
  0x42   : > { %526 = vmatpush.bf16.msra.mxu0 %v1036_v3  ;;  %1098 = vmatpush.bf16.msra.mxu2 %v1036_v3  ;;  %v433_v55 = vpack.c.bf16 %v421_v52, %v420_v51 }
  0x43   : > { %v437_v56 = vpack.c.bf16 %v429_v54, %v428_v53 }
  0x45   : > { %702 = vmatpush.bf16.msra.mxu1 %v1044_v43  ;;  %1106 = vmatpush.bf16.msra.mxu3 %v1044_v43 }
  0x46   : > { %527 = vmatpush.bf16.msra.mxu0 %v1035_v4  ;;  %1099 = vmatpush.bf16.msra.mxu2 %v1035_v4 }
  0x49   : > { %703 = vmatpush.bf16.msra.mxu1 %v1043_v46  ;;  %1107 = vmatpush.bf16.msra.mxu3 %v1043_v46 }
  0x4a   : > { %528 = vmatpush.bf16.msra.mxu0 %v1034_v5  ;;  %1100 = vmatpush.bf16.msra.mxu2 %v1034_v5 }
  0x4d   : > { %704 = vmatpush.bf16.msra.mxu1 %v1042_v57  ;;  %1108 = vmatpush.bf16.msra.mxu3 %v1042_v57 }
  0x4e   : > { %529 = vmatpush.bf16.msra.mxu0 %v1033_v12  ;;  %1101 = vmatpush.bf16.msra.mxu2 %v1033_v12 }
  0x51   : > { %705 = vmatpush.bf16.msra.mxu1 %v1041_v58  ;;  %1109 = vmatpush.bf16.msra.mxu3 %v1041_v58 }
  0x52   : > { %530 = vmatpush.bf16.msra.mxu0 %v1032_v17  ;;  %1102 = vmatpush.bf16.msra.mxu2 %v1032_v17 }
  0x55   : > { %531 = vmatmul.bf16.vlgmr.msra.gmra.mxu0 %v430_v18  ;;  %551 = vmatmul.bf16.vlgmr.msra.gmra.mxu2 %v434_v19 }
  0x56   : > { %706 = vmatpush.bf16.msra.mxu1 %v1040_v59  ;;  %1110 = vmatpush.bf16.msra.mxu3 %v1040_v59 }
  0x65   : > { %536 = vmatmul.bf16.gmra.mxu0 %v431_v28  ;;  %556 = vmatmul.bf16.gmra.mxu2 %v435_v29 }
  0x75   : > { %541 = vmatmul.bf16.gmra.mxu0 %v432_v44  ;;  %561 = vmatmul.bf16.gmra.mxu2 %v436_v45 }
  0x85   : > { %546 = vmatmul.bf16.gmra.mxu0 %v433_v55  ;;  %566 = vmatmul.bf16.gmra.mxu2 %v437_v56 }
  0xd2   : > { %v532_v60 = vpop.f32.mrf.mxu0 }
  0xd8   : > { %v552_v61 = vpop.f32.mrf.mxu2 }
  0xda   : > { %v534_v62 = vpop.f32.mrf.mxu0 }
  0xdb   : > { %v623_v63 = vpack.c.bf16 %v534_v62, %v532_v60 }
  0xdd   : > { %707 = vmatmul.bf16.vlgmr.msra.gmra.mxu1 %v623_v63 }
  0xe0   : > { %v554_v0 = vpop.f32.mrf.mxu2 }
  0xe1   : > { %v627_v1 = vpack.c.bf16 %v554_v0, %v552_v61 }
  0xe2   : > { %v537_v2 = vpop.f32.mrf.mxu0 }
  0xe3   : > { %727 = vmatmul.bf16.vlgmr.msra.gmra.mxu3 %v627_v1 }
  0xe8   : > { %v557_v3 = vpop.f32.mrf.mxu2 }
  0xea   : > { %v539_v4 = vpop.f32.mrf.mxu0 }
  0xeb   : > { %v624_v5 = vpack.c.bf16 %v539_v4, %v537_v2 }
  0xed   : > { %712 = vmatmul.bf16.gmra.mxu1 %v624_v5 }
  0xf0   : > { %v559_v6 = vpop.f32.mrf.mxu2 }
  0xf1   : > { %v628_v7 = vpack.c.bf16 %v559_v6, %v557_v3 }
  0xf2   : > { %v542_v8 = vpop.f32.mrf.mxu0 }
  0xf3   : > { %732 = vmatmul.bf16.gmra.mxu3 %v628_v7 }
  0xf8   : > { %v562_v9 = vpop.f32.mrf.mxu2 }
  0xfa   : > { %v544_v10 = vpop.f32.mrf.mxu0 }
  0xfb   : > { %v625_v11 = vpack.c.bf16 %v544_v10, %v542_v8 }
  0xfd   : > { %717 = vmatmul.bf16.gmra.mxu1 %v625_v11 }
 0x100   : > { %v564_v12 = vpop.f32.mrf.mxu2 }
 0x101   : > { %v629_v13 = vpack.c.bf16 %v564_v12, %v562_v9 }
 0x102   : > { %v547_v14 = vpop.f32.mrf.mxu0 }
 0x103   : > { %737 = vmatmul.bf16.gmra.mxu3 %v629_v13 }
 0x108   : > { %v567_v15 = vpop.f32.mrf.mxu2 }
 0x10a   : > { %v549_v16 = vpop.f32.mrf.mxu0 }
 0x10b   : > { %v626_v17 = vpack.c.bf16 %v549_v16, %v547_v14 }
 0x10d   : > { %722 = vmatmul.bf16.gmra.mxu1 %v626_v17 }
 0x110   : > { %v569_v18 = vpop.f32.mrf.mxu2 }
 0x111   : > { %v630_v19 = vpack.c.bf16 %v569_v18, %v567_v15 }
 0x113   : > { %742 = vmatmul.bf16.gmra.mxu3 %v630_v19 }
 0x15a   : > { %v708_v20 = vpop.f32.mrf.mxu1 }
 0x15b   : > { %v709_v23 = vadd.f32 %v1185_v21, %v708_v20 }
 0x162   : > { %v710_v22 = vpop.f32.mrf.mxu1 }
 0x163   : > { %v711_v24 = vadd.f32 %v1185_v21, %v710_v22 }
 0x165   : > { %v1051_v25 = vpack.c.bf16 %v711_v24, %v709_v23 }
 0x166   : > { %v728_v26 = vpop.f32.mrf.mxu3 }
 0x167   : > { %1052 = vst [vmem:[%s1547_s15] sm:$0xff] %v1051_v25   ;;  %v729_v29 = vadd.f32 %v1185_v21, %v728_v26 }
 0x16a   : > { %v713_v27 = vpop.f32.mrf.mxu1 }
 0x16b   : > { %v714_v33 = vadd.f32 %v1185_v21, %v713_v27 }
 0x16e   : > { %v730_v28 = vpop.f32.mrf.mxu3 }
 0x16f   : > { %v731_v30 = vadd.f32 %v1185_v21, %v730_v28 }
 0x171   : > { %v1071_v31 = vpack.c.bf16 %v731_v30, %v729_v29 }
 0x172   : > { %v715_v32 = vpop.f32.mrf.mxu1 }
 0x173   : > { %1091 = vst [vmem:[%s1547_s15 + $0x20] sm:$0xff] %v1071_v31   ;;  %v716_v34 = vadd.f32 %v1185_v21, %v715_v32 }
 0x175   : > { %v1056_v35 = vpack.c.bf16 %v716_v34, %v714_v33 }
 0x176   : > { %v733_v36 = vpop.f32.mrf.mxu3 }
 0x177   : > { %1088 = vst [vmem:[%s1547_s15 + $0x8] sm:$0xff] %v1056_v35   ;;  %v734_v39 = vadd.f32 %v1185_v21, %v733_v36 }
 0x17a   : > { %v718_v37 = vpop.f32.mrf.mxu1 }
 0x17b   : > { %v719_v43 = vadd.f32 %v1185_v21, %v718_v37 }
 0x17e   : > { %v735_v38 = vpop.f32.mrf.mxu3 }
 0x17f   : > { %v736_v40 = vadd.f32 %v1185_v21, %v735_v38 }
 0x181   : > { %v1076_v41 = vpack.c.bf16 %v736_v40, %v734_v39 }
 0x182   : > { %v720_v42 = vpop.f32.mrf.mxu1 }
 0x183   : > { %1092 = vst [vmem:[%s1547_s15 + $0x28] sm:$0xff] %v1076_v41   ;;  %v721_v44 = vadd.f32 %v1185_v21, %v720_v42 }
 0x185   : > { %v1061_v45 = vpack.c.bf16 %v721_v44, %v719_v43 }
 0x186   : > { %v738_v46 = vpop.f32.mrf.mxu3 }
 0x187   : > { %1089 = vst [vmem:[%s1547_s15 + $0x10] sm:$0xff] %v1061_v45   ;;  %v739_v49 = vadd.f32 %v1185_v21, %v738_v46 }
 0x18a   : > { %v723_v47 = vpop.f32.mrf.mxu1 }
 0x18b   : > { %v724_v53 = vadd.f32 %v1185_v21, %v723_v47 }
 0x18e   : > { %v740_v48 = vpop.f32.mrf.mxu3 }
 0x18f   : > { %v741_v50 = vadd.f32 %v1185_v21, %v740_v48 }
 0x191   : > { %v1081_v51 = vpack.c.bf16 %v741_v50, %v739_v49 }
 0x192   : > { %v725_v52 = vpop.f32.mrf.mxu1 }
 0x193   : > { %1093 = vst [vmem:[%s1547_s15 + $0x30] sm:$0xff] %v1081_v51   ;;  %v726_v54 = vadd.f32 %v1185_v21, %v725_v52 }
 0x195   : > { %v1066_v55 = vpack.c.bf16 %v726_v54, %v724_v53 }
 0x196   : > { %v743_v56 = vpop.f32.mrf.mxu3 }
 0x197   : > { %1090 = vst [vmem:[%s1547_s15 + $0x18] sm:$0xff] %v1066_v55   ;;  %v744_v58 = vadd.f32 %v1185_v21, %v743_v56 }
 0x19e   : > { %v745_v57 = vpop.f32.mrf.mxu3 }
 0x19f   : > { %v746_v59 = vadd.f32 %v1185_v21, %v745_v57 }
 0x1a1   : > { %v1086_v60 = vpack.c.bf16 %v746_v59, %v744_v58 }
 0x1a3   : > { %1094 = vst [vmem:[%s1547_s15 + $0x38] sm:$0xff] %v1086_v60  }
 0x1a4 PF: > { %s23_s20 = sadd.s32 1, %s1364_s20   ;;  %s1592_s18 = sld [smem:[#allocation14_spill]] }
 0x1a5   : > { %p20_p0 = scmp.ge.s32.totalorder %s23_s20, 5   ;;  %s1593_s23 = sld [smem:[#allocation13_spill]] }
 0x1a6   : > { %s1594_s15 = smov %s1348_s16  ;;  %s1595_s16 = smov %s1352_s17 }
 0x1a7   :  { %22 = sbr.rel (!%p20_p0) target bundleno = 11 (0xb), region = 122 }
 0x1aa   : > { %s1596_s17 = smov %s1592_s18  ;;  %s1597_s18 = smov %s1360_s19 }
 0x1ab   : > { %s1598_s19 = smov %s1593_s23 }
 0x1ac   :  { %810 = vsyncpa [#allocation4], 1 }
 0x1ad   :  { %812 = vsyncpa [#allocation4 + $0x1], 1 }
 0x1ae   :  { %813 = vsyncpa [#allocation6], 1 }
 0x1af   :  { %815 = vsyncpa [#allocation6 + $0x1], 1 }
 0x1b0   :  { %816 = vsyncpa [#allocation9], 1 }
 0x1b1   :  { %818 = vsyncpa [#allocation9 + $0x1], 1 }

</bundles_post_ra>
